<compile_context>
chip_gen: v7x
topology: tpu7x:2x2x1
jax: 0.10.0
libtpu: 0.0.40
codegen_flags: <defaults>
</compile_context>

<pallas_src>
import jax
import jax.numpy as jnp
from jax.experimental import pallas as pl
from jax.experimental.pallas import tpu as pltpu

# ----- config (small, consistent with the module) -----
BATCH = 2
SEQ_LEN = 16
EMBED = 32
NUM_FILTERS = 8
FILTER_SIZES = (2, 3, 4)
NUM_CLASSES = 4

K_MAX = max(FILTER_SIZES)                 # 4
KE = K_MAX * EMBED                        # 128
LOUT_PAD = 16                             # padded conv-output length (multiple of 8)
T_PAD = 24                                # padded time length (>= LOUT_PAD + K_MAX - 1), mult of 8
NF3 = NUM_FILTERS * len(FILTER_SIZES)     # 24 fused conv output channels
LANE = 128                                # lane-padded channel width (dense stores / full MXU lanes)
AUX_ROWS = 24                             # 16 bias/mask rows + 1 fc-bias row, sublane-padded

assert T_PAD >= LOUT_PAD + K_MAX - 1


def textcnn_kernel(x_ref, w_ref, aux_ref, out_ref):
    B = x_ref.shape[0] // T_PAD

    # In-kernel im2col: 4 accumulating K=EMBED MXU dots against the 4 tap blocks of the
    # conv-weight region (rows 0:KE of w_ref); tap i's result is aligned by a static
    # time slice so acc[b, t] = sum_i x[b, t + i] @ W_tap_i.
    x = x_ref[...]                                                    # (B*T_PAD, E) bf16
    acc = None
    for i in range(K_MAX):
        y = jnp.dot(x, w_ref[i * EMBED:(i + 1) * EMBED, :],
                    preferred_element_type=jnp.float32)               # (B*T_PAD, 128) f32
        y = y.reshape(B, T_PAD, LANE)[:, i:i + LOUT_PAD, :]           # align tap i
        acc = y if acc is None else acc + y                           # (B, 16, 128) f32

    # Per-position conv bias + validity mask (-1e9 on positions past each branch's Lout),
    # then ReLU.  Safe ONLY because ReLU precedes the max: masked positions clamp to 0.
    acc = acc + aux_ref[0:LOUT_PAD, :][None, :, :]
    acc = jnp.maximum(acc, 0.0)
    pooled = jnp.max(acc, axis=1)                                     # (B, 128) max-over-time

    # TODO(synk): dropout is identity in eval mode; training-mode dropout not implemented.

    # fc: single bf16 MXU pass against rows KE:KE+LANE of the weight slab, + f32 bias row.
    out = jnp.dot(pooled.astype(jnp.bfloat16), w_ref[KE:KE + LANE, :],
                  preferred_element_type=jnp.float32)                 # (B, 128) f32
    out_ref[...] = out + aux_ref[LOUT_PAD:LOUT_PAD + 1, :]


def pack_params(params):
    """Wrapper-side layout plumbing: fuse all weights into one bf16 slab + one f32 aux slab."""
    w2, b2, w3, b3, w4, b4, fcw, fcb = params
    F = NUM_FILTERS

    # bf16 weight slab (KE+LANE, LANE):
    #   rows 0:KE      -> fused conv weights: branch j occupies columns [j*F, (j+1)*F);
    #                     rows [i*E, (i+1)*E) hold tap i (pre-transposed to (E, F));
    #                     rows >= k*E for a size-k branch are zero.
    #   rows KE:KE+LANE-> fc weight transposed, lane-padded: rows KE+f hold fcw[:, f] in cols 0:C.
    slab = jnp.zeros((KE + LANE, LANE), jnp.float32)
    for j, (w, k) in enumerate(zip((w2, w3, w4), FILTER_SIZES)):
        wt = jnp.transpose(w, (1, 2, 0)).reshape(k * EMBED, F)        # (k*E, F)
        slab = slab.at[:k * EMBED, j * F:(j + 1) * F].set(wt)
    slab = slab.at[KE:KE + NF3, :NUM_CLASSES].set(fcw.T)
    w_slab = slab.astype(jnp.bfloat16)

    # f32 aux slab (AUX_ROWS, LANE):
    #   rows 0:16 -> per-position conv bias (valid t) / -1e9 (padded t) in cols 0:3F, 0 elsewhere.
    #   row  16   -> fc bias in cols 0:C.
    b_cat = jnp.concatenate([b2.reshape(-1), b3.reshape(-1), b4.reshape(-1)])     # (3F,)
    limits = jnp.repeat(jnp.array([SEQ_LEN - k + 1 for k in FILTER_SIZES]), F)    # (3F,)
    t_idx = jnp.arange(LOUT_PAD)[:, None]                                         # (16, 1)
    bias_mask = jnp.where(t_idx < limits[None, :], b_cat[None, :], -1e9)          # (16, 3F)
    aux = jnp.zeros((AUX_ROWS, LANE), jnp.float32)
    aux = aux.at[:LOUT_PAD, :NF3].set(bias_mask)
    aux = aux.at[LOUT_PAD, :NUM_CLASSES].set(fcb.reshape(-1))
    return w_slab, aux


@jax.jit
def textcnn_forward(x, w_slab, aux):
    B, L, E = x.shape
    # Only XLA-side prep: one small fused pad + reshape + bf16 cast (no 4x im2col duplication).
    x_flat = (jnp.pad(x, ((0, 0), (0, T_PAD - L), (0, 0)))
              .reshape(B * T_PAD, E).astype(jnp.bfloat16))            # (B*24, 32)

    vmem = lambda: pl.BlockSpec(memory_space=pltpu.MemorySpace.VMEM)
    bytes_accessed = (B * T_PAD * E * 2 + (KE + LANE) * LANE * 2
                      + AUX_ROWS * LANE * 4 + B * LANE * 4)
    out = pl.pallas_call(
        textcnn_kernel,
        out_shape=jax.ShapeDtypeStruct((B, LANE), jnp.float32),        # lane-dense output slab
        in_specs=[vmem(), vmem(), vmem()],
        out_specs=vmem(),
        cost_estimate=pl.CostEstimate(
            flops=2 * B * LOUT_PAD * KE * NF3 + 2 * B * NF3 * NUM_CLASSES,
            transcendentals=0,
            bytes_accessed=bytes_accessed),
    )(x_flat, w_slab, aux)
    return out[:, :NUM_CLASSES]


def reference_forward(x, params):
    """Pure-JAX reference matching the PyTorch forward semantics.

    Mirrors the kernel's bf16 rounding of MXU inputs (x, conv weights, pooled features, fc
    weight) so the comparison measures kernel correctness, not input quantization.
    """
    w2, b2, w3, b3, w4, b4, fcw, fcb = params
    hp = jax.lax.Precision.HIGHEST
    bf = lambda a: a.astype(jnp.bfloat16).astype(jnp.float32)
    xb = bf(x)
    feats = []
    for (w, b, k) in ((w2, b2, 2), (w3, b3, 3), (w4, b4, 4)):
        wb = bf(w)
        Lout = SEQ_LEN - k + 1
        cols = []
        for t in range(Lout):
            window = xb[:, t:t + k, :].reshape(x.shape[0], -1)                   # (B, k*E)
            cols.append(jnp.dot(window, wb.reshape(NUM_FILTERS, -1).T,
                                precision=hp) + b)                               # (B, F)
        conv = jnp.stack(cols, axis=1)                                           # (B, Lout, F)
        feats.append(jnp.max(jax.nn.relu(conv), axis=1))                         # (B, F)
    feat = jnp.concatenate(feats, axis=1)                                        # (B, 3F)
    return jnp.dot(bf(feat), bf(fcw).T, precision=hp) + fcb


def init_params(key):
    keys = jax.random.split(key, 8)
    def w(k, shape, scale=0.1):
        return (scale * jax.random.normal(k, shape)).astype(jnp.float32)
    w2 = w(keys[0], (NUM_FILTERS, 2, EMBED))
    b2 = w(keys[1], (1, NUM_FILTERS))
    w3 = w(keys[2], (NUM_FILTERS, 3, EMBED))
    b3 = w(keys[3], (1, NUM_FILTERS))
    w4 = w(keys[4], (NUM_FILTERS, 4, EMBED))
    b4 = w(keys[5], (1, NUM_FILTERS))
    fcw = w(keys[6], (NUM_CLASSES, NF3))
    fcb = w(keys[7], (1, NUM_CLASSES))
    return (w2, b2, w3, b3, w4, b4, fcw, fcb)


if __name__ == "__main__":
    key = jax.random.PRNGKey(0)
    kx, kp = jax.random.split(key)
    x = jax.random.normal(kx, (BATCH, SEQ_LEN, EMBED), dtype=jnp.float32)
    params = init_params(kp)

    w_slab, aux = pack_params(params)          # one-time weight packing
    out = textcnn_forward(x, w_slab, aux)
    out = jax.block_until_ready(out)

    ref = reference_forward(x, params)
    assert out.shape == (BATCH, NUM_CLASSES), out.shape
    assert jnp.allclose(out, ref, atol=2e-3, rtol=2e-3), (out, ref)

    print("KERNEL_OK")
</pallas_src>

<mosaic_0001>
module attributes {stable_mosaic.version = 11 : i64} {
  func.func @textcnn_kernel(%arg0: memref<48x32xbf16, #tpu.memory_space<vmem>>, %arg1: memref<256x128xbf16, #tpu.memory_space<vmem>>, %arg2: memref<24x128xf32, #tpu.memory_space<vmem>>, %arg3: memref<2x128xf32, #tpu.memory_space<vmem>>) attributes {dimension_semantics = [], scalar_prefetch = 0 : i64, scratch_operands = 0 : i64, tpu.core_type = #tpu.core_type<tc>} {
    %c0 = arith.constant 0 : index
    %c0_0 = arith.constant 0 : index
    %0 = vector.load %arg0[%c0, %c0_0] : memref<48x32xbf16, #tpu.memory_space<vmem>>, vector<48x32xbf16>
    %c0_1 = arith.constant 0 : index
    %c0_2 = arith.constant 0 : index
    %1 = vector.load %arg1[%c0_1, %c0_2] : memref<256x128xbf16, #tpu.memory_space<vmem>>, vector<32x128xbf16>
    %cst = arith.constant dense<0.000000e+00> : vector<48x128xf32>
    %2 = tpu.matmul %0, %1, %cst {dimension_numbers = #tpu.dot_dimension_numbers<[1], [0], [0], [1], [0, 0, 1, 1], [], []>} : vector<48x32xbf16>, vector<32x128xbf16>, vector<48x128xf32> -> vector<48x128xf32>
    %3 = vector.shape_cast %2 : vector<48x128xf32> to vector<2x24x128xf32>
    %4 = vector.extract_strided_slice %3 {offsets = [0, 0, 0], sizes = [2, 16, 128], strides = [1, 1, 1]} : vector<2x24x128xf32> to vector<2x16x128xf32>
    %c32 = arith.constant 32 : index
    %c0_3 = arith.constant 0 : index
    %5 = vector.load %arg1[%c32, %c0_3] : memref<256x128xbf16, #tpu.memory_space<vmem>>, vector<32x128xbf16>
    %cst_4 = arith.constant dense<0.000000e+00> : vector<48x128xf32>
    %6 = tpu.matmul %0, %5, %cst_4 {dimension_numbers = #tpu.dot_dimension_numbers<[1], [0], [0], [1], [0, 0, 1, 1], [], []>} : vector<48x32xbf16>, vector<32x128xbf16>, vector<48x128xf32> -> vector<48x128xf32>
    %7 = vector.shape_cast %6 : vector<48x128xf32> to vector<2x24x128xf32>
    %8 = vector.extract_strided_slice %7 {offsets = [0, 1, 0], sizes = [2, 16, 128], strides = [1, 1, 1]} : vector<2x24x128xf32> to vector<2x16x128xf32>
    %9 = arith.addf %4, %8 : vector<2x16x128xf32>
    %c64 = arith.constant 64 : index
    %c0_5 = arith.constant 0 : index
    %10 = vector.load %arg1[%c64, %c0_5] : memref<256x128xbf16, #tpu.memory_space<vmem>>, vector<32x128xbf16>
    %cst_6 = arith.constant dense<0.000000e+00> : vector<48x128xf32>
    %11 = tpu.matmul %0, %10, %cst_6 {dimension_numbers = #tpu.dot_dimension_numbers<[1], [0], [0], [1], [0, 0, 1, 1], [], []>} : vector<48x32xbf16>, vector<32x128xbf16>, vector<48x128xf32> -> vector<48x128xf32>
    %12 = vector.shape_cast %11 : vector<48x128xf32> to vector<2x24x128xf32>
    %13 = vector.extract_strided_slice %12 {offsets = [0, 2, 0], sizes = [2, 16, 128], strides = [1, 1, 1]} : vector<2x24x128xf32> to vector<2x16x128xf32>
    %14 = arith.addf %9, %13 : vector<2x16x128xf32>
    %c96 = arith.constant 96 : index
    %c0_7 = arith.constant 0 : index
    %15 = vector.load %arg1[%c96, %c0_7] : memref<256x128xbf16, #tpu.memory_space<vmem>>, vector<32x128xbf16>
    %cst_8 = arith.constant dense<0.000000e+00> : vector<48x128xf32>
    %16 = tpu.matmul %0, %15, %cst_8 {dimension_numbers = #tpu.dot_dimension_numbers<[1], [0], [0], [1], [0, 0, 1, 1], [], []>} : vector<48x32xbf16>, vector<32x128xbf16>, vector<48x128xf32> -> vector<48x128xf32>
    %17 = vector.shape_cast %16 : vector<48x128xf32> to vector<2x24x128xf32>
    %18 = vector.extract_strided_slice %17 {offsets = [0, 3, 0], sizes = [2, 16, 128], strides = [1, 1, 1]} : vector<2x24x128xf32> to vector<2x16x128xf32>
    %19 = arith.addf %14, %18 : vector<2x16x128xf32>
    %c0_9 = arith.constant 0 : index
    %c0_10 = arith.constant 0 : index
    %20 = vector.load %arg2[%c0_9, %c0_10] : memref<24x128xf32, #tpu.memory_space<vmem>>, vector<16x128xf32>
    %21 = vector.shape_cast %20 : vector<16x128xf32> to vector<1x16x128xf32>
    %22 = vector.broadcast %21 : vector<1x16x128xf32> to vector<2x16x128xf32>
    %23 = arith.addf %19, %22 : vector<2x16x128xf32>
    %cst_11 = arith.constant 0.000000e+00 : f32
    %24 = vector.broadcast %cst_11 : f32 to vector<2x16x128xf32>
    %25 = arith.maximumf %23, %24 : vector<2x16x128xf32>
    %cst_12 = arith.constant dense<0xFF800000> : vector<2x128xf32>
    %26 = vector.multi_reduction <maximumf>, %25, %cst_12 [1] : vector<2x16x128xf32> to vector<2x128xf32>
    %27 = arith.truncf %26 : vector<2x128xf32> to vector<2x128xbf16>
    %c128 = arith.constant 128 : index
    %c0_13 = arith.constant 0 : index
    %28 = vector.load %arg1[%c128, %c0_13] : memref<256x128xbf16, #tpu.memory_space<vmem>>, vector<128x128xbf16>
    %cst_14 = arith.constant dense<0.000000e+00> : vector<2x128xf32>
    %29 = tpu.matmul %27, %28, %cst_14 {dimension_numbers = #tpu.dot_dimension_numbers<[1], [0], [0], [1], [0, 0, 1, 1], [], []>} : vector<2x128xbf16>, vector<128x128xbf16>, vector<2x128xf32> -> vector<2x128xf32>
    %c16 = arith.constant 16 : index
    %c0_15 = arith.constant 0 : index
    %30 = vector.load %arg2[%c16, %c0_15] : memref<24x128xf32, #tpu.memory_space<vmem>>, vector<1x128xf32>
    %31 = vector.broadcast %30 : vector<1x128xf32> to vector<2x128xf32>
    %32 = arith.addf %29, %31 : vector<2x128xf32>
    %c0_16 = arith.constant 0 : index
    %c0_17 = arith.constant 0 : index
    %33 = vector.load %arg3[%c0_16, %c0_17] : memref<2x128xf32, #tpu.memory_space<vmem>>, vector<2x128xf32>
    tpu.vector_store %arg3[%c0_16, %c0_17], %32 {strides = array<i32>} : memref<2x128xf32, #tpu.memory_space<vmem>>, vector<2x128xf32>,
    return
  }
}

</mosaic_0001>

<bundles_post_ra>
// kernel: textcnn_forward.1
= control target key start
LH: loop header
LB: loop body
LE: loop exit
PB: predicated region body
PF: predicated region fallthrough
CT: control target
= control target key end

     0   :  { %8 = vsyncpa [#allocation3], 0  ;;  %s943_s0 = inlined_call_operand.vmem [shape: bf16[48,32], index: 0, kind: input, shape index: {}]   ;;  %s944_s1 = inlined_call_operand.hbm [shape: bf16[256,128], index: 1, kind: input, shape index: {}]   ;;  %s945_s2 = inlined_call_operand.vmem [shape: f32[24,128], index: 2, kind: input, shape index: {}]   ;;  %s946_s3 = inlined_call_operand.hbm [shape: f32[2,128], index: 3, kind: output, shape index: {}]  }
   0x1   :  { %9 = vsyncpa [#allocation4], 0  ;;  %s807_s12 = smov [#allocation2]   ;;  %s759_s16 = scalar_lea.hbm %s944_s1, 2048 }
   0x2   :  { %s17_s13 = sshll.u32 %s807_s12, 4  ;;  %p760_p0 = scmp.ne.s32.totalorder %s944_s1, %s759_s16  ;;  %s18_s13 = int_to_ptr.vmem [resolvable:$true] %s17_s13 }
   0x3   :  { %p763_p1 = scmp.lt.u32.totalorder %s759_s16, %s944_s1 }
   0x5   :  { %p765_p2 = pnand %p763_p1, %p760_p0 }
   0x7   :  { %768 = shalt.err (!%p765_p2)
}
   0x8   :  { %s769_s21 = scalar_lea.vmem %s18_s13, 2048  ;;  %p774_p4 = scmp.lt.s32.totalorder %s18_s13, %s18_s13 }
   0x9   :  { %p770_p3 = scmp.ne.s32.totalorder %s18_s13, %s769_s21  ;;  %p775_p5 = scmp.lt.s32.totalorder %s769_s21, %s769_s21 }
   0xb   :  { %p776_p6 = por %p775_p5, %p774_p4 }
   0xd   :  { %p777_p7 = pnand %p776_p6, %p770_p3 }
   0xf   :  { %780 = shalt.err (!%p777_p7)
}
  0x10   :  { %s808_s22 = smov 64   ;;  %s809_s23 = smov 4  }
  0x11   :  { %23 = dma.hbm_to_vmem [thread:$0]  %s944_s1, 2048, %s18_s13, [#allocation3], %s808_s22, %s808_s22, %s809_s23  }
  0x12   :  { %803 = dma.done.wait [#allocation3], 2048  }
  0x13   :  { %804 = vsyncadd [#allocation3], 4294965248  ;;  %v810_v0 = vmov 0.0   ;;  %vm811_vm0 = vmmov 0   ;;  %v740_v1 = vld [vmem:[#allocation2] sm:$0xff]   ;;  %v741_v2 = vld [vmem:[#allocation2 + $0x8] sm:$0xff]  }
  0x14   :  { %646 = vmatprep.subr.bf16.mxu0 %v810_v0  ;;  %730 = vmatprep.subr.bf16.mxu1 %v810_v0  ;;  %v742_v3 = vld [vmem:[%s943_s0] sm:$0xff]   ;;  %v743_v4 = vld [vmem:[%s943_s0 + $0x10] sm:$0xff]   ;;  %vm67_vm1 = vcmask 261120   ;;  %v745_v7 = vld [vmem:[#allocation2 + $0x18] sm:$0xff]   ;;  %vm211_vm2 = vcmask 1046528   ;;  %vm309_vm3 = vcmask 1045504  }
  0x15   :  { %650 = vmatprep.mubr.msk.bf16.mxu0 %vm811_vm0, %v810_v0  ;;  %658 = vmatprep.mubr.msk.bf16.mxu1 %vm811_vm0, %v810_v0  ;;  %v744_v5 = vld [vmem:[#allocation2 + $0x10] sm:$0xff]   ;;  %v747_v6 = vld [vmem:[#allocation2 + $0x20] sm:$0xff]   ;;  %v749_v8 = vld [vmem:[#allocation2 + $0x28] sm:$0xff]   ;;  %vm407_vm4 = vcmask 1044480   ;;  %vm477_vm5 = vcmask 1041409   ;;  %s812_s9 = smov [#allocation5]  }
  0x16   :  { %647 = vmatpush3.bf16.msra.mxu0 %v740_v1  ;;  %732 = vmatpush3.bf16.msra.mxu1 %v740_v1  ;;  %v746_v9 = vld [vmem:[%s943_s0 + $0x8] sm:$0xff]   ;;  %v748_v10 = vld [vmem:[#allocation2 + $0x30] sm:$0xff]   ;;  %v750_v11 = vld [vmem:[#allocation2 + $0x38] sm:$0xff]   ;;  %s576_s10 = sshll.u32 %s812_s9, 4  ;;  %s577_s10 = int_to_ptr.vmem [resolvable:$true] %s576_s10 }
  0x17   :  { %648 = vmatprep.subr.bf16.mxu0 %v810_v0  ;;  %731 = vmatprep.subr.bf16.mxu1 %v810_v0  ;;  %v751_v12 = vld [vmem:[#allocation2 + $0x40] sm:$0xff]   ;;  %v752_v13 = vld [vmem:[#allocation2 + $0x48] sm:$0xff]   ;;  %v753_v14 = vld [vmem:[#allocation2 + $0x50] sm:$0xff]   ;;  %s781_s11 = scalar_lea.vmem %s577_s10, 32  ;;  %p786_p9 = scmp.lt.s32.totalorder %s577_s10, %s577_s10 }
  0x18   :  { %v754_v15 = vld [vmem:[#allocation2 + $0x58] sm:$0xff]   ;;  %v755_v16 = vld [vmem:[#allocation2 + $0x60] sm:$0xff]   ;;  %v756_v17 = vld [vmem:[#allocation2 + $0x68] sm:$0xff]   ;;  %p782_p8 = scmp.ne.s32.totalorder %s577_s10, %s781_s11  ;;  %p787_p10 = scmp.lt.s32.totalorder %s781_s11, %s781_s11 }
  0x19   :  { %v757_v18 = vld [vmem:[#allocation2 + $0x70] sm:$0xff]   ;;  %v758_v19 = vld [vmem:[#allocation2 + $0x78] sm:$0xff]  }
  0x1a   :  { %649 = vmatpush3.bf16.msra.mxu0 %v741_v2  ;;  %733 = vmatpush3.bf16.msra.mxu1 %v741_v2  ;;  %p788_p11 = por %p787_p10, %p786_p9 }
  0x1b   :  { %662 = vmatprep.subr.bf16.mxu1 %v810_v0  ;;  %678 = vmatprep.subr.bf16.mxu0 %v810_v0 }
  0x1c   :  { %p789_p12 = pnand %p788_p11, %p782_p8 }
  0x1d   :  { %651 = vmatmul.mubr.msk.bf16.vlgmr.msra.gmra.mrb[0].mxu0 %vm67_vm1, %v742_v3  ;;  %659 = vmatmul.mubr.msk.bf16.vlgmr.msra.gmra.mrb[0].mxu1 %vm67_vm1, %v743_v4 }
  0x1e   :  { %663 = vmatpush3.bf16.msra.mxu1 %v744_v5  ;;  %654 = vmatprep.mubr.msk.bf16.mxu0 %vm811_vm0, %v810_v0 }
  0x1f   :  { %664 = vmatprep.subr.bf16.mxu1 %v810_v0  ;;  %666 = vmatprep.mubr.msk.bf16.mxu1 %vm811_vm0, %v810_v0 }
  0x20   :  { %679 = vmatpush3.bf16.msra.mxu0 %v747_v6 }
  0x21   :  { %680 = vmatprep.subr.bf16.mxu0 %v810_v0 }
  0x22   :  { %665 = vmatpush3.bf16.msra.mxu1 %v745_v7 }
  0x23   :  { %694 = vmatprep.subr.bf16.mxu1 %v810_v0 }
  0x24   :  { %681 = vmatpush3.bf16.msra.mxu0 %v749_v8 }
  0x25   :  { %655 = vmatmul.mubr.msk.bf16.gmra.mrb[4].mxu0 %vm67_vm1, %v746_v9  ;;  %667 = vmatmul.mubr.msk.bf16.vlgmr.msra.gmra.mrb[4].mxu1 %vm67_vm1, %v742_v3 }
  0x26   :  { %695 = vmatpush3.bf16.msra.mxu1 %v748_v10  ;;  %670 = vmatprep.mubr.msk.bf16.mxu1 %vm811_vm0, %v810_v0 }
  0x27   :  { %682 = vmatprep.mubr.msk.bf16.mxu0 %vm811_vm0, %v810_v0  ;;  %696 = vmatprep.subr.bf16.mxu1 %v810_v0 }
  0x28   :  { %710 = vmatprep.subr.bf16.mxu0 %v810_v0 }
  0x2a   :  { %697 = vmatpush3.bf16.msra.mxu1 %v750_v11 }
  0x2d   :  { %671 = vmatmul.mubr.msk.bf16.gmra.mrb[8].mxu1 %vm67_vm1, %v746_v9  ;;  %683 = vmatmul.mubr.msk.bf16.vlgmr.msra.gmra.mrb[8].mxu0 %vm67_vm1, %v742_v3 }
  0x2e   :  { %674 = vmatprep.mubr.msk.bf16.mxu1 %vm811_vm0, %v810_v0  ;;  %686 = vmatprep.mubr.msk.bf16.mxu0 %vm811_vm0, %v810_v0 }
  0x2f   :  { %711 = vmatpush3.bf16.msra.mxu0 %v751_v12 }
  0x30   :  { %712 = vmatprep.subr.bf16.mxu0 %v810_v0 }
  0x33   :  { %713 = vmatpush3.bf16.msra.mxu0 %v752_v13 }
  0x34   :  { %714 = vmatprep.subr.bf16.mxu0 %v810_v0 }
  0x35   :  { %675 = vmatmul.mubr.msk.bf16.gmra.mrb[12].mxu1 %vm67_vm1, %v743_v4  ;;  %687 = vmatmul.mubr.msk.bf16.gmra.mrb[12].mxu0 %vm67_vm1, %v746_v9 }
  0x36   :  { %690 = vmatprep.mubr.msk.bf16.mxu0 %vm811_vm0, %v810_v0  ;;  %698 = vmatprep.mubr.msk.bf16.mxu1 %vm811_vm0, %v810_v0 }
  0x37   :  { %715 = vmatpush3.bf16.msra.mxu0 %v753_v14 }
  0x38   :  { %716 = vmatprep.subr.bf16.mxu0 %v810_v0 }
  0x3b   :  { %717 = vmatpush3.bf16.msra.mxu0 %v754_v15 }
  0x3c   :  { %718 = vmatprep.subr.bf16.mxu0 %v810_v0 }
  0x3d   :  { %691 = vmatmul.mubr.msk.bf16.gmra.mrb[16].mxu0 %vm67_vm1, %v743_v4  ;;  %699 = vmatmul.mubr.msk.bf16.vlgmr.msra.gmra.mrb[16].mxu1 %vm67_vm1, %v742_v3 }
  0x3e   :  { %702 = vmatprep.mubr.msk.bf16.mxu1 %vm811_vm0, %v810_v0  ;;  %726 = vmatprep.mubr.msk.bf16.mxu0 %vm811_vm0, %v810_v0 }
  0x3f   :  { %719 = vmatpush3.bf16.msra.mxu0 %v755_v16 }
  0x40   :  { %720 = vmatprep.subr.bf16.mxu0 %v810_v0 }
  0x43   :  { %721 = vmatpush3.bf16.msra.mxu0 %v756_v17 }
  0x44   :  { %722 = vmatprep.subr.bf16.mxu0 %v810_v0 }
  0x45   :  { %703 = vmatmul.mubr.msk.bf16.gmra.mrb[20].mxu1 %vm67_vm1, %v746_v9 }
  0x46   :  { %706 = vmatprep.mubr.msk.bf16.mxu1 %vm811_vm0, %v810_v0 }
  0x47   :  { %723 = vmatpush3.bf16.msra.mxu0 %v757_v18 }
  0x48   :  { %724 = vmatprep.subr.bf16.mxu0 %v810_v0 }
  0x4b   :  { %725 = vmatpush3.bf16.msra.mxu0 %v758_v19 }
  0x4d   :  { %707 = vmatmul.mubr.msk.bf16.gmra.mrb[24].mxu1 %vm67_vm1, %v743_v4 }
  0xf0   :  { %v126_v20 = vpop.f32.mrb[0].mxu1  ;;  %v111_v21 = vpop.f32.mrb[0].mxu0 }
  0xf1   :  { %v660_v22 = vpop.f32.mrb[1].mxu1  ;;  %v652_v23 = vpop.f32.mrb[1].mxu0 }
  0xf2   :  { %v129_v24 = vpop.f32.mrb[2].mxu1  ;;  %v114_v25 = vpop.f32.mrb[2].mxu0 }
  0xf3   :  { %v661_v26 = vpop.f32.mrb[3].mxu1  ;;  %v653_v27 = vpop.f32.mrb[3].mxu0 }
  0xf8   :  { %v182_v28 = vpop.f32.mrb[4].mxu1  ;;  %v119_v29 = vpop.f32.mrb[4].mxu0 }
  0xf9   :  { %v668_v30 = vpop.f32.mrb[5].mxu1  ;;  %v656_v31 = vpop.f32.mrb[5].mxu0  ;;  %v212_v34 = vrot.slane %v182_v28, 1  ;;  %v426_v29 = vld [vmem:[%s945_s2] sm:$0xff] }
  0xfa   :  { %v185_v32 = vpop.f32.mrb[6].mxu1  ;;  %v121_v33 = vpop.f32.mrb[6].mxu0 }
  0xfb   :  { %v213_v35 = vrot.slane %v185_v32, 1  ;;  %v669_v36 = vpop.f32.mrb[7].mxu1  ;;  %v657_v37 = vpop.f32.mrb[7].mxu0 }
  0xfd   :  { %v214_v38 = vsel %vm211_vm2, %v212_v34, %v213_v35  ;;  %v427_v34 = vld [vmem:[%s945_s2 + $0x8] sm:$0xff] }
  0xfe   :  { %v226_v39 = vadd.f32 %v214_v38, %v111_v21 }
 0x100   :  { %v190_v40 = vpop.f32.mrb[8].mxu1  ;;  %v280_v41 = vpop.f32.mrb[8].mxu0 }
 0x101   :  { %v215_v42 = vrot.slane %v190_v40, 1  ;;  %v310_v43 = vrot.slane %v280_v41, 2  ;;  %v672_v44 = vpop.f32.mrb[9].mxu1  ;;  %v684_v45 = vpop.f32.mrb[9].mxu0 }
 0x102   :  { %v193_v46 = vpop.f32.mrb[10].mxu1  ;;  %v283_v47 = vpop.f32.mrb[10].mxu0 }
 0x103   :  { %v216_v48 = vsel %vm211_vm2, %v213_v35, %v215_v42  ;;  %v311_v49 = vrot.slane %v283_v47, 2  ;;  %v673_v50 = vpop.f32.mrb[11].mxu1  ;;  %v685_v51 = vpop.f32.mrb[11].mxu0  ;;  %v217_v57 = vrot.slane %v193_v46, 1 }
 0x104   :  { %v227_v52 = vadd.f32 %v216_v48, %v114_v25 }
 0x105   :  { %v312_v53 = vsel %vm309_vm3, %v310_v43, %v311_v49 }
 0x106   :  { %v324_v54 = vadd.f32 %v312_v53, %v226_v39 }
 0x108   :  { %v198_v55 = vpop.f32.mrb[12].mxu1  ;;  %v288_v56 = vpop.f32.mrb[12].mxu0 }
 0x109   :  { %v218_v58 = vrot.slane %v198_v55, 1  ;;  %v313_v59 = vrot.slane %v288_v56, 2  ;;  %v676_v60 = vpop.f32.mrb[13].mxu1  ;;  %v688_v61 = vpop.f32.mrb[13].mxu0 }
 0x10a   :  { %v201_v62 = vpop.f32.mrb[14].mxu1  ;;  %v291_v63 = vpop.f32.mrb[14].mxu0 }
 0x10b   :  { %v219_v0 = vsel %vm211_vm2, %v217_v57, %v218_v58  ;;  %v314_v1 = vsel %vm309_vm3, %v311_v49, %v313_v59  ;;  %v220_v2 = vrot.slane %v201_v62, 1  ;;  %v677_v3 = vpop.f32.mrb[15].mxu1  ;;  %v689_v4 = vpop.f32.mrb[15].mxu0  ;;  %v315_v9 = vrot.slane %v291_v63, 2 }
 0x10c   :  { %v228_v5 = vadd.f32 %v219_v0, %v121_v33  ;;  %v325_v6 = vadd.f32 %v314_v1, %v227_v52 }
 0x10d   :  { %v221_v7 = vsel %vm211_vm2, %v218_v58, %v220_v2 }
 0x10e   :  { %v229_v8 = vadd.f32 %v221_v7, %v126_v20 }
 0x110   :  { %v296_v10 = vpop.f32.mrb[16].mxu0  ;;  %v378_v11 = vpop.f32.mrb[16].mxu1 }
 0x111   :  { %v316_v12 = vrot.slane %v296_v10, 2  ;;  %v692_v13 = vpop.f32.mrb[17].mxu0  ;;  %v700_v14 = vpop.f32.mrb[17].mxu1  ;;  %v408_v18 = vrot.slane %v378_v11, 3 }
 0x112   :  { %v299_v15 = vpop.f32.mrb[18].mxu0  ;;  %v381_v16 = vpop.f32.mrb[18].mxu1 }
 0x113   :  { %v317_v17 = vsel %vm309_vm3, %v315_v9, %v316_v12  ;;  %v318_v19 = vrot.slane %v299_v15, 2  ;;  %v409_v21 = vrot.slane %v381_v16, 3  ;;  %v701_v22 = vpop.f32.mrb[19].mxu1  ;;  %v693_v23 = vpop.f32.mrb[19].mxu0 }
 0x114   :  { %v326_v24 = vadd.f32 %v317_v17, %v228_v5 }
 0x115   :  { %v319_v25 = vsel %vm309_vm3, %v316_v12, %v318_v19  ;;  %v410_v20 = vsel %vm407_vm4, %v408_v18, %v409_v21  ;;  %v608_v12 = vld [vmem:[%s945_s2 + $0x10] ss:$0 sm:$0xff] }
 0x116   :  { %v327_v26 = vadd.f32 %v319_v25, %v229_v8  ;;  %v422_v27 = vadd.f32 %v410_v20, %v324_v54 }
 0x118   :  { %v386_v28 = vpop.f32.mrb[20].mxu1  ;;  %v428_v36 = vadd.f32 %v426_v29, %v422_v27 }
 0x119   :  { %v411_v30 = vrot.slane %v386_v28, 3  ;;  %v704_v31 = vpop.f32.mrb[21].mxu1 }
 0x11a   :  { %v389_v32 = vpop.f32.mrb[22].mxu1  ;;  %v432_v39 = vmax.f32 %v428_v36, 0.0 }
 0x11b   :  { %v412_v33 = vsel %vm407_vm4, %v409_v21, %v411_v30  ;;  %v705_v35 = vpop.f32.mrb[23].mxu1  ;;  %v413_v42 = vrot.slane %v389_v32, 3 }
 0x11c   :  { %v423_v37 = vadd.f32 %v412_v33, %v325_v6 }
 0x11e   :  { %v429_v38 = vadd.f32 %v427_v34, %v423_v37 }
 0x120   :  { %v433_v40 = vmax.f32 %v429_v38, 0.0  ;;  %v394_v41 = vpop.f32.mrb[24].mxu1 }
 0x121   :  { %v414_v43 = vrot.slane %v394_v41, 3  ;;  %v708_v44 = vpop.f32.mrb[25].mxu1 }
 0x122   :  { %v436_v45 = vmax.f32 %v432_v39, %v433_v40  ;;  %v397_v46 = vpop.f32.mrb[26].mxu1 }
 0x123   :  { %v415_v47 = vsel %vm407_vm4, %v413_v42, %v414_v43  ;;  %v416_v48 = vrot.slane %v397_v46, 3  ;;  %v709_v49 = vpop.f32.mrb[27].mxu1 }
 0x124   :  { %v437_v50 = vrot.slane %v436_v45, 4  ;;  %v424_v51 = vadd.f32 %v415_v47, %v326_v24 }
 0x125   :  { %v417_v52 = vsel %vm407_vm4, %v414_v43, %v416_v48 }
 0x126   :  { %v438_v53 = vmax.f32 %v436_v45, %v437_v50  ;;  %v430_v54 = vadd.f32 %v426_v29, %v424_v51  ;;  %v425_v55 = vadd.f32 %v417_v52, %v327_v26 }
 0x128   :  { %v439_v56 = vrot.slane %v438_v53, 2  ;;  %v431_v57 = vadd.f32 %v427_v34, %v425_v55  ;;  %v434_v58 = vmax.f32 %v430_v54, 0.0 }
 0x12a   :  { %v435_v59 = vmax.f32 %v431_v57, 0.0  ;;  %v440_v60 = vmax.f32 %v438_v53, %v439_v56 }
 0x12c   :  { %v443_v61 = vmax.f32 %v434_v58, %v435_v59  ;;  %v441_v63 = vrot.slane %v440_v60, 1 }
 0x12e   :  { %v444_v62 = vrot.slane %v443_v61, 4  ;;  %v442_v2 = vmax.f32 %v440_v60, %v441_v63 }
 0x130   :  { %v445_v0 = vmax.f32 %v443_v61, %v444_v62  ;;  %v450_v5 = vpack.c.bf16 %v442_v2, %v442_v2 }
 0x132   :  { %v446_v1 = vrot.slane %v445_v0, 2  ;;  %v475_v8 = vunpack.c.l.b16 %v450_v5 }
 0x134   :  { %v447_v3 = vmax.f32 %v445_v0, %v446_v1 }
 0x136   :  { %v448_v4 = vrot.slane %v447_v3, 1 }
 0x138   :  { %v449_v6 = vmax.f32 %v447_v3, %v448_v4 }
 0x13a   :  { %v451_v7 = vpack.c.bf16 %v449_v6, %v449_v6 }
 0x13c   :  { %v476_v9 = vunpack.c.l.b16 %v451_v7 }
 0x13e   :  { %v478_v10 = vsel %vm477_vm5, %v476_v9, %v475_v8 }
 0x13f   :  { %v479_v11 = vpack.c.b16 %v478_v10, %v478_v10 }
 0x141   :  { %727 = vmatmul.mubr.bf16.vlgmr.msra.gmra.mrb[20].mxu0 %v479_v11 }
 0x214   :  { %v563_v13 = vpop.f32.mrb[20].mxu0 }
 0x215   :  { %v564_v14 = vadd.f32 %v608_v12, %v563_v13  ;;  %v728_v15 = vpop.f32.mrb[21].mxu0 }
 0x216   :  { %v566_v16 = vpop.f32.mrb[22].mxu0 }
 0x217   :  { %569 = vst [vmem:[#allocation5] sm:$0x3] %v564_v14  ;;  %v729_v17 = vpop.f32.mrb[23].mxu0 }
 0x218   :  { %792 = shalt.err (!%p789_p12)
}
 0x219   :  { %s793_s2 = scalar_lea.hbm %s946_s3, 32 }
 0x21a   :  { %p794_p13 = scmp.ne.s32.totalorder %s946_s3, %s793_s2  ;;  %p797_p0 = scmp.lt.u32.totalorder %s793_s2, %s946_s3 }
 0x21c   :  { %p799_p1 = pnand %p797_p0, %p794_p13 }
 0x21e   :  { %802 = shalt.err (!%p799_p1)
}
 0x21f   :  { %579 = dma.vmem_to_hbm [thread:$0]  %s577_s10, 32, %s946_s3, [#allocation4]  }
 0x220   :  { %805 = dma.done.wait [#allocation4], 32  }
 0x221   :  { %806 = vsyncadd [#allocation4], 4294967264 }
 0x222   :  { %583 = vsyncpa [#allocation3], 1 }
 0x223   :  { %584 = vsyncpa [#allocation4], 1 }

</bundles_post_ra>
